<compile_context>
chip_gen: v7x
topology: tpu7x:2x2x1
jax: 0.10.0
libtpu: 0.0.40
codegen_flags: <defaults>
</compile_context>

<pallas_src>
import jax
import jax.numpy as jnp
from jax.experimental import pallas as pl
from jax.experimental.pallas import tpu as pltpu


# ---------------------------------------------------------------------------
# Kernel
# ---------------------------------------------------------------------------
def _nca_prob_kernel(x_ref, lab_ref, y_ref, eself_ref, prob_ref, p_acc, z_acc):
    kn = pl.program_id(1)  # reduction step over the memory-bank axis

    @pl.when(kn == 0)
    def _():
        p_acc[...] = jnp.zeros_like(p_acc)
        z_acc[...] = jnp.zeros_like(z_acc)

    TB, TN = x_ref.shape
    n_chunks = TN // 128

    # Own labels, lane-broadcast ONCE per grid step (not re-emitted per chunk).
    y_b = jnp.broadcast_to(y_ref[...], (TB, 128))              # (TB,128) int32

    # Stream the tile in (TB,128) chunks: exp + same-label select per chunk,
    # accumulate into lane-wide partials with plain VPU adds.  The single
    # cross-lane XLU reduction happens only once, in the finalize.
    e0 = jnp.exp(x_ref[:, 0:128])
    z_part = e0
    p_part = jnp.where(y_b == lab_ref[:, 0:128], e0, 0.0)
    for c in range(1, n_chunks):                               # static, lane-aligned
        sl = slice(c * 128, (c + 1) * 128)
        ei = jnp.exp(x_ref[:, sl])
        z_part = z_part + ei
        p_part = p_part + jnp.where(y_b == lab_ref[:, sl], ei, 0.0)

    p_acc[...] += p_part
    z_acc[...] += z_part

    @pl.when(kn == pl.num_programs(1) - 1)
    def _():
        e_self = eself_ref[...]                                # (TB, 1)
        # The self column always has the same label as itself, so it was
        # counted in BOTH sums; subtract it from both (== scatter_(1, idx, 0)).
        p = jnp.sum(p_acc[...], axis=1, keepdims=True) - e_self
        z = jnp.sum(z_acc[...], axis=1, keepdims=True) - e_self
        # Exact division: runs once per batch tile, completely off the hot loop.
        prob_ref[...] = p / z


# ---------------------------------------------------------------------------
# Tile-size selection
# ---------------------------------------------------------------------------
def _vmem_budget_bytes():
    """Per-kernel VMEM budget: ~cap/4 (~32 MiB on 128 MiB parts, ~16 MiB on v7x)."""
    try:
        cap = pltpu.get_tpu_info().vmem_capacity_bytes
    except Exception:
        cap = 128 * 1024 * 1024
    return max(8 * 1024 * 1024, cap // 4)


def _pick_tb(B):
    if B % 8 != 0:
        return B                      # full-dim block is always legal
    if B < 16:
        return B                      # cannot make >= 2 tiles of >= 8 rows
    # Largest multiple of 8 dividing B, capped so that (a) B//tb >= 2 (keeps
    # the 'parallel' batch axis real on v7x's two TensorCores) and (b) tb<=256.
    cap = min(256, B // 2)
    tb = 8
    for cand in range(8, cap + 1, 8):
        if B % cand == 0:
            tb = cand
    return tb


def _pick_tn(n, tb, budget_bytes):
    assert n % 128 == 0, "memory-bank size n must be a multiple of 128"
    # VMEM accounting (double-buffered inputs; (1,tn)/(tb,1) blocks pad to 8/128):
    fixed = 2 * tb * 128 * 4 + 6 * tb * 128 * 4        # scratch + small blocks
    per_lane = 2 * (tb * 4 + 8 * 4)                    # x rows + padded labels row
    max_tn_budget = max(128, (budget_bytes - fixed) // per_lane)
    # Target ~2 MiB of x per grid step (>=512 KiB reaches ~85%+ of HBM roofline);
    # keep the static per-128-lane chunk unroll bounded at 64 chunks.
    target_tn = max(128, (2 * 1024 * 1024) // (tb * 4))
    max_tn = min(max_tn_budget, target_tn, 64 * 128, n)
    tn = 128
    cand = 256
    while cand <= max_tn:
        if n % cand == 0:
            tn = cand
        cand += 128
    return tn


# ---------------------------------------------------------------------------
# Wrapper
# ---------------------------------------------------------------------------
def nca_prob(x, labels, indexes, *, tn=None, tb=None):
    """Returns prob = p/Z of shape (B,) computed in a Pallas kernel."""
    B, n = x.shape
    x = x.astype(jnp.float32)
    labels = labels.astype(jnp.int32)
    indexes = indexes.astype(jnp.int32)

    budget = _vmem_budget_bytes()
    if tb is None:
        tb = _pick_tb(B)
    if tn is None:
        tn = _pick_tn(n, tb, budget)
    assert B % tb == 0, "B must be a multiple of the batch tile"
    assert n % tn == 0 and tn % 128 == 0, "n must be a multiple of the lane tile"

    lab2d = labels.reshape(1, n)
    y = labels[indexes].reshape(B, 1)                                        # own labels
    e_self = jnp.exp(jnp.take_along_axis(x, indexes.reshape(B, 1), axis=1))  # (B,1)

    prob = pl.pallas_call(
        _nca_prob_kernel,
        out_shape=jax.ShapeDtypeStruct((B, 1), jnp.float32),
        grid_spec=pltpu.PrefetchScalarGridSpec(
            num_scalar_prefetch=0,
            grid=(B // tb, n // tn),                      # (parallel batch, reduction last)
            in_specs=[
                pl.BlockSpec((tb, tn), lambda b, k: (b, k)),   # x tile
                pl.BlockSpec((1, tn), lambda b, k: (0, k)),    # labels tile
                pl.BlockSpec((tb, 1), lambda b, k: (b, 0)),    # own labels
                pl.BlockSpec((tb, 1), lambda b, k: (b, 0)),    # exp(x[b, idx[b]])
            ],
            out_specs=pl.BlockSpec((tb, 1), lambda b, k: (b, 0)),
            scratch_shapes=[
                pltpu.VMEM((tb, 128), jnp.float32),            # lane-wide p accumulator
                pltpu.VMEM((tb, 128), jnp.float32),            # lane-wide Z accumulator
            ],
        ),
        compiler_params=pltpu.CompilerParams(
            dimension_semantics=("parallel", "arbitrary"),
            vmem_limit_bytes=int(budget),
        ),
    )(x, lab2d, y, e_self)
    return prob[:, 0]


def nca_lp_loss(x, indexes, labels, weights, q=0.7, k=0.5):
    prob = nca_prob(x, labels, indexes)                     # (B,)
    bw = weights[indexes][:, 0]                             # (B,)
    Lq = (1.0 - prob ** q) / q                              # (B,)
    const = (1.0 - k ** q) / q
    # Faithful to torch's (B,)*(B,1)->(B,B) broadcast followed by mean():
    #   mean_{i,j}(Lq[j]*bw[i] - const*bw[i]) = mean(Lq)*mean(bw) - const*mean(bw)
    mbw = jnp.mean(bw)
    return jnp.mean(Lq) * mbw - const * mbw


# ---------------------------------------------------------------------------
# Pure-JAX reference (materializes the (B,B) broadcast like torch does)
# ---------------------------------------------------------------------------
def _reference_loss(x, indexes, labels, weights, q=0.7, k=0.5):
    B, n = x.shape
    e = jnp.exp(x.astype(jnp.float32))
    col = jnp.arange(n)[None, :]
    e = e * (col != indexes[:, None]).astype(jnp.float32)
    same = (labels[indexes][:, None] == labels[None, :]).astype(jnp.float32)
    p = jnp.sum(e * same, axis=1)
    Z = jnp.sum(e, axis=1)
    prob = p / Z
    bw = weights[indexes]                                   # (B, 1)
    Lq = (1.0 - prob ** q) / q                              # (B,)
    const = (1.0 - k ** q) / q
    return jnp.mean(Lq * bw - const * bw)                   # (B,B) broadcast, like torch


def _reference_prob(x, indexes, labels):
    n = x.shape[1]
    e = jnp.exp(x.astype(jnp.float32))
    col = jnp.arange(n)[None, :]
    e = e * (col != indexes[:, None]).astype(jnp.float32)
    same = (labels[indexes][:, None] == labels[None, :]).astype(jnp.float32)
    return jnp.sum(e * same, axis=1) / jnp.sum(e, axis=1)


if __name__ == "__main__":
    key = jax.random.PRNGKey(0)
    kx, klab, kidx = jax.random.split(key, 3)

    # --- config 1: matches the module's forward at small shapes ---
    B = 8
    train_size = 256
    num_classes = 10

    x = jax.random.normal(kx, (B, train_size), dtype=jnp.float32) * 0.5
    labels = jax.random.randint(klab, (train_size,), 0, num_classes, dtype=jnp.int32)
    indexes = jax.random.permutation(kidx, train_size)[:B].astype(jnp.int32)
    weights = jnp.ones((train_size, 1), dtype=jnp.float32)   # buffer init: torch.ones

    loss = jax.block_until_ready(nca_lp_loss(x, indexes, labels, weights))
    ref = jax.block_until_ready(_reference_loss(x, indexes, labels, weights))
    assert jnp.allclose(loss, ref, rtol=1e-4, atol=1e-5), (loss, ref)

    # --- config 2: exercises multi-step reduction + parallel batch-tile axis ---
    B2, n2 = 16, 512
    kx2, klab2, kidx2 = jax.random.split(jax.random.PRNGKey(1), 3)
    x2 = jax.random.normal(kx2, (B2, n2), dtype=jnp.float32) * 0.5
    labels2 = jax.random.randint(klab2, (n2,), 0, num_classes, dtype=jnp.int32)
    indexes2 = jax.random.permutation(kidx2, n2)[:B2].astype(jnp.int32)

    prob2 = jax.block_until_ready(nca_prob(x2, labels2, indexes2, tn=128, tb=8))
    ref_prob2 = jax.block_until_ready(_reference_prob(x2, indexes2, labels2))
    assert jnp.allclose(prob2, ref_prob2, rtol=1e-4, atol=1e-5), (prob2, ref_prob2)

    # --- config 3: auto-picked tiles on the larger shape ---
    prob3 = jax.block_until_ready(nca_prob(x2, labels2, indexes2))
    assert jnp.allclose(prob3, ref_prob2, rtol=1e-4, atol=1e-5), (prob3, ref_prob2)

    print("KERNEL_OK")
</pallas_src>

<mosaic_0001>
module attributes {stable_mosaic.version = 11 : i64} {
  func.func @_nca_prob_kernel(%arg0: i32, %arg1: i32, %arg2: memref<8x256xf32, #tpu.memory_space<vmem>>, %arg3: memref<1x256xi32, #tpu.memory_space<vmem>>, %arg4: memref<8x1xi32, #tpu.memory_space<vmem>>, %arg5: memref<8x1xf32, #tpu.memory_space<vmem>>, %arg6: memref<8x1xf32, #tpu.memory_space<vmem>>, %arg7: memref<8x128xf32, #tpu.memory_space<vmem>>, %arg8: memref<8x128xf32, #tpu.memory_space<vmem>>) attributes {dimension_semantics = [#tpu.dimension_semantics<parallel>, #tpu.dimension_semantics<arbitrary>], iteration_bounds = array<i64: 1, 1>, scalar_prefetch = 0 : i64, scratch_operands = 2 : i64, tpu.core_type = #tpu.core_type<tc>, window_params = [{transform_indices = @transform_0, window_bounds = array<i64: 8, 256>}, {transform_indices = @transform_1, window_bounds = array<i64: 1, 256>}, {transform_indices = @transform_2, window_bounds = array<i64: 8, 1>}, {transform_indices = @transform_3, window_bounds = array<i64: 8, 1>}, {transform_indices = @transform_4, window_bounds = array<i64: 8, 1>}]} {
    %c0_i32 = arith.constant 0 : i32
    %0 = arith.cmpi eq, %arg1, %c0_i32 : i32
    %1 = arith.extui %0 : i1 to i32
    %c0_i32_0 = arith.constant 0 : i32
    %2 = arith.cmpi ne, %1, %c0_i32_0 : i32
    scf.if %2 {
      %cst_20 = arith.constant 0.000000e+00 : f32
      %31 = vector.broadcast %cst_20 : f32 to vector<8x128xf32>
      %c0_21 = arith.constant 0 : index
      %c0_22 = arith.constant 0 : index
      %32 = vector.load %arg7[%c0_21, %c0_22] : memref<8x128xf32, #tpu.memory_space<vmem>>, vector<8x128xf32>
      tpu.vector_store %arg7[%c0_21, %c0_22], %31 {strides = array<i32>} : memref<8x128xf32, #tpu.memory_space<vmem>>, vector<8x128xf32>,
      %cst_23 = arith.constant 0.000000e+00 : f32
      %33 = vector.broadcast %cst_23 : f32 to vector<8x128xf32>
      %c0_24 = arith.constant 0 : index
      %c0_25 = arith.constant 0 : index
      %34 = vector.load %arg8[%c0_24, %c0_25] : memref<8x128xf32, #tpu.memory_space<vmem>>, vector<8x128xf32>
      tpu.vector_store %arg8[%c0_24, %c0_25], %33 {strides = array<i32>} : memref<8x128xf32, #tpu.memory_space<vmem>>, vector<8x128xf32>,
    } else {
    }
    %c0 = arith.constant 0 : index
    %c0_1 = arith.constant 0 : index
    %3 = vector.load %arg4[%c0, %c0_1] : memref<8x1xi32, #tpu.memory_space<vmem>>, vector<8x1xi32>
    %4 = vector.shape_cast %3 : vector<8x1xi32> to vector<8x1xi32>
    %5 = vector.broadcast %4 : vector<8x1xi32> to vector<8x128xi32>
    %c0_2 = arith.constant 0 : index
    %c0_3 = arith.constant 0 : index
    %6 = vector.load %arg2[%c0_2, %c0_3] : memref<8x256xf32, #tpu.memory_space<vmem>>, vector<8x128xf32>
    %7 = math.exp %6 : vector<8x128xf32>
    %c0_4 = arith.constant 0 : index
    %c0_5 = arith.constant 0 : index
    %8 = vector.load %arg3[%c0_4, %c0_5] : memref<1x256xi32, #tpu.memory_space<vmem>>, vector<1x128xi32>
    %9 = vector.broadcast %8 : vector<1x128xi32> to vector<8x128xi32>
    %10 = arith.cmpi eq, %5, %9 : vector<8x128xi32>
    %cst = arith.constant 0.000000e+00 : f32
    %11 = vector.broadcast %cst : f32 to vector<8x128xf32>
    %12 = arith.select %10, %7, %11 : vector<8x128xi1>, vector<8x128xf32>
    %c0_6 = arith.constant 0 : index
    %c128 = arith.constant 128 : index
    %13 = vector.load %arg2[%c0_6, %c128] : memref<8x256xf32, #tpu.memory_space<vmem>>, vector<8x128xf32>
    %14 = math.exp %13 : vector<8x128xf32>
    %15 = arith.addf %7, %14 : vector<8x128xf32>
    %c0_7 = arith.constant 0 : index
    %c128_8 = arith.constant 128 : index
    %16 = vector.load %arg3[%c0_7, %c128_8] : memref<1x256xi32, #tpu.memory_space<vmem>>, vector<1x128xi32>
    %17 = vector.broadcast %16 : vector<1x128xi32> to vector<8x128xi32>
    %18 = arith.cmpi eq, %5, %17 : vector<8x128xi32>
    %cst_9 = arith.constant 0.000000e+00 : f32
    %19 = vector.broadcast %cst_9 : f32 to vector<8x128xf32>
    %20 = arith.select %18, %14, %19 : vector<8x128xi1>, vector<8x128xf32>
    %21 = arith.addf %12, %20 : vector<8x128xf32>
    %c0_10 = arith.constant 0 : index
    %c0_11 = arith.constant 0 : index
    %22 = vector.load %arg7[%c0_10, %c0_11] : memref<8x128xf32, #tpu.memory_space<vmem>>, vector<8x128xf32>
    %23 = arith.addf %22, %21 : vector<8x128xf32>
    %c0_12 = arith.constant 0 : index
    %c0_13 = arith.constant 0 : index
    %24 = vector.load %arg7[%c0_12, %c0_13] : memref<8x128xf32, #tpu.memory_space<vmem>>, vector<8x128xf32>
    tpu.vector_store %arg7[%c0_12, %c0_13], %23 {strides = array<i32>} : memref<8x128xf32, #tpu.memory_space<vmem>>, vector<8x128xf32>,
    %c0_14 = arith.constant 0 : index
    %c0_15 = arith.constant 0 : index
    %25 = vector.load %arg8[%c0_14, %c0_15] : memref<8x128xf32, #tpu.memory_space<vmem>>, vector<8x128xf32>
    %26 = arith.addf %25, %15 : vector<8x128xf32>
    %c0_16 = arith.constant 0 : index
    %c0_17 = arith.constant 0 : index
    %27 = vector.load %arg8[%c0_16, %c0_17] : memref<8x128xf32, #tpu.memory_space<vmem>>, vector<8x128xf32>
    tpu.vector_store %arg8[%c0_16, %c0_17], %26 {strides = array<i32>} : memref<8x128xf32, #tpu.memory_space<vmem>>, vector<8x128xf32>,
    %c0_i32_18 = arith.constant 0 : i32
    %28 = arith.cmpi eq, %arg1, %c0_i32_18 : i32
    %29 = arith.extui %28 : i1 to i32
    %c0_i32_19 = arith.constant 0 : i32
    %30 = arith.cmpi ne, %29, %c0_i32_19 : i32
    scf.if %30 {
      %c0_20 = arith.constant 0 : index
      %c0_21 = arith.constant 0 : index
      %31 = vector.load %arg5[%c0_20, %c0_21] : memref<8x1xf32, #tpu.memory_space<vmem>>, vector<8x1xf32>
      %c0_22 = arith.constant 0 : index
      %c0_23 = arith.constant 0 : index
      %32 = vector.load %arg7[%c0_22, %c0_23] : memref<8x128xf32, #tpu.memory_space<vmem>>, vector<8x128xf32>
      %cst_24 = arith.constant dense<0.000000e+00> : vector<8xf32>
      %33 = vector.multi_reduction <add>, %32, %cst_24 [1] : vector<8x128xf32> to vector<8xf32>
      %34 = vector.shape_cast %33 : vector<8xf32> to vector<8x1xf32>
      %35 = arith.subf %34, %31 : vector<8x1xf32>
      %c0_25 = arith.constant 0 : index
      %c0_26 = arith.constant 0 : index
      %36 = vector.load %arg8[%c0_25, %c0_26] : memref<8x128xf32, #tpu.memory_space<vmem>>, vector<8x128xf32>
      %cst_27 = arith.constant dense<0.000000e+00> : vector<8xf32>
      %37 = vector.multi_reduction <add>, %36, %cst_27 [1] : vector<8x128xf32> to vector<8xf32>
      %38 = vector.shape_cast %37 : vector<8xf32> to vector<8x1xf32>
      %39 = arith.subf %38, %31 : vector<8x1xf32>
      %40 = arith.divf %35, %39 : vector<8x1xf32>
      %c0_28 = arith.constant 0 : index
      %c0_29 = arith.constant 0 : index
      %41 = vector.load %arg6[%c0_28, %c0_29] : memref<8x1xf32, #tpu.memory_space<vmem>>, vector<8x1xf32>
      tpu.vector_store %arg6[%c0_28, %c0_29], %40 {strides = array<i32>} : memref<8x1xf32, #tpu.memory_space<vmem>>, vector<8x1xf32>,
    } else {
    }
    return
  }
  func.func @transform_0(%arg0: i32, %arg1: i32) -> (i32, i32) {
    %c0_i32 = arith.constant 0 : i32
    return %arg0, %arg1 : i32, i32
  }
  func.func @transform_1(%arg0: i32, %arg1: i32) -> (i32, i32) {
    %c0_i32 = arith.constant 0 : i32
    %c0_i32_0 = arith.constant 0 : i32
    return %c0_i32, %arg1 : i32, i32
  }
  func.func @transform_2(%arg0: i32, %arg1: i32) -> (i32, i32) {
    %c0_i32 = arith.constant 0 : i32
    %c0_i32_0 = arith.constant 0 : i32
    return %arg0, %c0_i32 : i32, i32
  }
  func.func @transform_3(%arg0: i32, %arg1: i32) -> (i32, i32) {
    %c0_i32 = arith.constant 0 : i32
    %c0_i32_0 = arith.constant 0 : i32
    return %arg0, %c0_i32 : i32, i32
  }
  func.func @transform_4(%arg0: i32, %arg1: i32) -> (i32, i32) {
    %c0_i32 = arith.constant 0 : i32
    %c0_i32_0 = arith.constant 0 : i32
    return %arg0, %c0_i32 : i32, i32
  }
}

</mosaic_0001>

<bundles_post_ra>
// kernel: tpu_custom_call.1
= control target key start
LH: loop header
LB: loop body
LE: loop exit
PB: predicated region body
PF: predicated region fallthrough
CT: control target
= control target key end

     0   :  { %v85_v0 = vmov 0   ;;  %vm69_vm2 = vcmask 7168   ;;  %s132_s2 = inlined_call_operand.vmem [shape: s32[8,1], index: 2, kind: input, shape index: {}]   ;;  %s133_s0 = inlined_call_operand.vmem [shape: f32[8,256], index: 0, kind: input, shape index: {}]   ;;  %s134_s1 = inlined_call_operand.vmem [shape: s32[1,256], index: 1, kind: input, shape index: {}]   ;;  %s135_s3 = inlined_call_operand.vmem [shape: f32[8,1], index: 3, kind: input, shape index: {}]   ;;  %s136_s4 = inlined_call_operand.vmem [shape: f32[8,1], index: 4, kind: output, shape index: {}]  }
   0x1   :  { %78 = vset.pattern.permute.xlu0 %v85_v0  ;;  %v23_v1 = vld [vmem:[%s132_s2] sm:$0xff]  ;;  %v37_v3 = vld [vmem:[%s133_s0 + $0x8] sm:$0xff] }
   0x2   :  { %25 = vperm.xlu0 %78, %v23_v1   ;;  %v27_v2 = vld [vmem:[%s133_s0] sm:$0xff]  ;;  %v38_v5 = vmul.f32 1.442695, %v37_v3 }
   0x3   :  { %v28_v4 = vmul.f32 1.442695, %v27_v2  ;;  %v75_v9 = vld [vmem:[%s134_s1] ss:$0 sm:$0xff]  ;;  %v76_v10 = vld [vmem:[%s134_s1 + $0x1] ss:$0 sm:$0xff] }
   0x4   :  { %v58_v15 = vld [vmem:[%s135_s3] sm:$0xff] }
   0x5   :  { %79 = vpow2.f32 %v28_v4 }
   0x6   :  { %81 = vpow2.f32 %v38_v5 }
   0xf   :  { %v80_v6 = vpop.eup %79 }
  0x10   :  { %v82_v7 = vpop.eup %81 }
  0x11   :  { %v40_v8 = vadd.f32 %v82_v7, %v80_v6 }
  0x21   :  { %64 = vadd.xlane.f32.xlu0 %v40_v8 }
  0x81   :  { %v26_v11 = vpop.permute.xlu0 %25 }
  0x82   :  { %vm35_vm0 = vcmp.eq.s32.totalorder %v26_v11, %v75_v9  ;;  %vm46_vm1 = vcmp.eq.s32.totalorder %v26_v11, %v76_v10 }
  0x83   :  { %v36_v12 = vsel %vm35_vm0, %v80_v6, 0.0  ;;  %v47_v13 = vsel %vm46_vm1, %v82_v7, 0.0 }
  0x84   :  { %v48_v14 = vadd.f32 %v47_v13, %v36_v12 }
  0x86   :  { %60 = vadd.xlane.f32.xlu1 %v48_v14 }
  0xae   :  { %v65_v16 = vpop.xlane.xlu0 %64 }
  0xaf   :  { %v66_v17 = vsub.f32 %v65_v16, %v58_v15 }
  0xb1   :  { %83 = vrcp.f32 %v66_v17 }
  0xbb   :  { %v84_v18 = vpop.eup %83 }
 0x113   :  { %v61_v19 = vpop.xlane.xlu1 %60 }
 0x114   :  { %v62_v20 = vsub.f32 %v61_v19, %v58_v15 }
 0x116   :  { %v68_v21 = vmul.f32 %v84_v18, %v62_v20 }
 0x118   :  { %70 = vst.msk [vmem:[%s136_s4] sm:$0xff] %vm69_vm2, %v68_v21 }

</bundles_post_ra>
